<compile_context>
chip_gen: v5e
topology: v5e:2x2
jax: 0.10.0
libtpu: 0.0.40
codegen_flags: <defaults>
</compile_context>

<pallas_src>
from functools import partial

import jax
import jax.numpy as jnp
from jax.experimental import pallas as pl
from jax.experimental.pallas import tpu as pltpu

# Synthetic hyper-parameters consistent with the PyTorch module.
INPUT_SAMPLES = 16             # L (sequence length)
OUTPUT_FEATURES = 8
C_IN = 2
C_OUT = 16
HIDDEN = 128
K = 3                          # conv kernel size (padding=1, stride=1)
FLAT = INPUT_SAMPLES * C_OUT   # 256 (flattened conv output per sample)
OUT_PAD = 128                  # lane-dense padded output width (>= 128)


def cnn_kernel(x_ref, wc_ref, bc_ref, w1_ref, b1_ref, w2_ref, b2_ref, o_ref):
    """One batch tile per grid step.  Three clean 2-D matmuls, no relayouts.

    x_ref  : (bt, L*C_IN)   flattened raw input (row index l*C_IN + c)
    wc_ref : (L*C_IN, FLAT) Toeplitz conv matrix (conv1d k=3, pad=1 + flatten)
    bc_ref : (1, FLAT)      conv bias tiled per position (f32)
    w1_ref : (FLAT, HIDDEN) fc1 weight, rows permuted to l-major / c-minor
    b1_ref : (1, HIDDEN)    f32
    w2_ref : (HIDDEN, OUT_PAD)  fc2 weight zero-padded to 128 lanes
    b2_ref : (1, OUT_PAD)   f32, zero-padded
    o_ref  : (bt, OUT_PAD)  f32, lane-dense store
    """
    # Conv1d(k=3, pad=1) + flatten as a single matmul (32-deep contraction).
    conv = jnp.dot(x_ref[...], wc_ref[...], preferred_element_type=jnp.float32)
    conv = jnp.maximum(conv + bc_ref[...], 0.0)                  # (bt, 256) f32
    conv = conv.astype(w1_ref.dtype)                             # compute dtype

    # fc1 + ReLU
    h = jnp.dot(conv, w1_ref[...], preferred_element_type=jnp.float32)
    h = jnp.maximum(h + b1_ref[...], 0.0).astype(w2_ref.dtype)   # (bt, 128)

    # fc2 — full-lane (bt, 128) store; padded columns are exact zeros.
    o_ref[...] = (jnp.dot(h, w2_ref[...], preferred_element_type=jnp.float32)
                  + b2_ref[...]).astype(o_ref.dtype)


def _round_up(n, m):
    return ((n + m - 1) // m) * m


def _is_dual_core_tpu():
    """True on TPU generations with 2 TensorCores per chip (v7x)."""
    try:
        kind = jax.devices()[0].device_kind.lower()
    except Exception:
        return False
    return ("v7" in kind) or ("tpu7" in kind)


def _toeplitz_conv_weight(w_conv, L):
    """(C_OUT, C_IN, K) Conv1d weight -> (L*C_IN, L*C_OUT) Toeplitz matrix.

    W[m*C_IN + c, l*C_OUT + o] = w_conv[o, c, m - l + 1] when 0 <= m-l+1 < K, else 0.
    With x_flat[b, m*C_IN + c] = x_blc[b, m, c], x_flat @ W equals the padded conv
    output laid out l-major / c-minor (column index l*C_OUT + o).
    """
    m_idx = jnp.arange(L)[:, None]
    l_idx = jnp.arange(L)[None, :]
    k_idx = m_idx - l_idx + 1                                     # (L, L)
    valid = (k_idx >= 0) & (k_idx < K)
    k_clamped = jnp.clip(k_idx, 0, K - 1)
    w_ck_o = jnp.transpose(w_conv, (1, 2, 0))                     # (C_IN, K, C_OUT)
    toep = w_ck_o[:, k_clamped, :]                                # (C_IN, L, L, C_OUT)
    toep = jnp.where(valid[None, :, :, None], toep,
                     jnp.zeros((), dtype=toep.dtype))
    # (m, c, l, o) -> rows m*C_IN+c, cols l*C_OUT+o
    return jnp.transpose(toep, (1, 0, 2, 3)).reshape(L * C_IN, L * C_OUT)


@partial(jax.jit, static_argnames=("block_batch", "compute_dtype"))
def cnn_forward(x_blc, w_conv, b_conv, w_fc1, b_fc1, w_fc2, b_fc2,
                *, block_batch=None, compute_dtype=jnp.float32):
    """x_blc: (B, L, C_IN) float32 -- same data the PyTorch module receives.

    w_conv: (C_OUT, C_IN, K)    (PyTorch Conv1d layout)
    w_fc1 : (HIDDEN, C_OUT*L)   (PyTorch Linear layout, channel-major flatten)
    w_fc2 : (OUTPUT_FEATURES, HIDDEN)
    """
    B, L, C = x_blc.shape
    assert L == INPUT_SAMPLES and C == C_IN

    # ---- Weight preprocessing (fused/constant-folded under the end-to-end jit). ----
    wc = _toeplitz_conv_weight(w_conv, L)                          # (32, 256)
    bc = jnp.tile(b_conv, (L,)).reshape(1, FLAT)                   # (1, 256)

    # PyTorch flattens (B, C_OUT, L) channel-major (index o*L + l); the kernel's
    # conv output is l-major / c-minor (index l*C_OUT + o) -> permute fc1 rows.
    wf1 = jnp.transpose(w_fc1.reshape(HIDDEN, C_OUT, L), (2, 1, 0)).reshape(FLAT, HIDDEN)
    bf1 = b_fc1.reshape(1, HIDDEN)

    # Lane-dense fc2: zero-pad output dim 8 -> 128 so the final store is unmasked.
    wf2 = jnp.zeros((HIDDEN, OUT_PAD), w_fc2.dtype).at[:, :OUTPUT_FEATURES].set(w_fc2.T)
    bf2 = jnp.zeros((1, OUT_PAD), jnp.float32).at[:, :OUTPUT_FEATURES].set(b_fc2)

    # bf16 activations/weights feed the MXU natively; f32 accumulation/bias/ReLU.
    x_flat = x_blc.reshape(B, L * C_IN).astype(compute_dtype)      # (B, 32)
    wc = wc.astype(compute_dtype)
    wf1 = wf1.astype(compute_dtype)
    wf2 = wf2.astype(compute_dtype)
    bc = bc.astype(jnp.float32)
    bf1 = bf1.astype(jnp.float32)

    # ---- Batch tiling: grid=1 on single-TC chips, 128-row tiles on v7x. ----
    b8 = _round_up(B, 8)
    if block_batch is None:
        if _is_dual_core_tpu() and b8 >= 256:
            bt = 128                       # one tile per TensorCore
        else:
            bt = min(b8, 512)              # whole (small) batch in one grid step
    else:
        bt = min(block_batch, b8)
    b_pad = _round_up(B, bt)
    if b_pad != B:
        # Padded rows produce relu(bias)-driven garbage; they are sliced off below.
        x_flat = jnp.pad(x_flat, ((0, b_pad - B), (0, 0)))
    num_tiles = b_pad // bt

    whole = lambda shape: pl.BlockSpec(shape, lambda i: (0,) * len(shape))

    out = pl.pallas_call(
        cnn_kernel,
        out_shape=jax.ShapeDtypeStruct((b_pad, OUT_PAD), jnp.float32),
        grid_spec=pltpu.PrefetchScalarGridSpec(
            num_scalar_prefetch=0,
            grid=(num_tiles,),
            in_specs=[
                pl.BlockSpec((bt, L * C_IN), lambda i: (i, 0)),    # flattened input
                whole((L * C_IN, FLAT)),                           # Toeplitz conv W
                whole((1, FLAT)),                                  # conv bias
                whole((FLAT, HIDDEN)),                             # fc1 weight
                whole((1, HIDDEN)),                                # fc1 bias
                whole((HIDDEN, OUT_PAD)),                          # fc2 weight (padded)
                whole((1, OUT_PAD)),                               # fc2 bias   (padded)
            ],
            out_specs=pl.BlockSpec((bt, OUT_PAD), lambda i: (i, 0)),
        ),
        compiler_params=pltpu.CompilerParams(
            dimension_semantics=("parallel",),     # shards tiles across v7x TCs
        ),
    )(x_flat, wc, bc, wf1, bf1, wf2, bf2)

    return out[:B, :OUTPUT_FEATURES]


def reference_forward(x_blc, w_conv, b_conv, w_fc1, b_fc1, w_fc2, b_fc2):
    """Pure-JAX reference matching the PyTorch forward exactly."""
    x_ncl = jnp.transpose(x_blc, (0, 2, 1))                        # x.transpose(1, 2)
    y = jax.lax.conv_general_dilated(
        x_ncl, w_conv, window_strides=(1,), padding=[(1, 1)],
        dimension_numbers=("NCH", "OIH", "NCH"))
    y = jax.nn.relu(y + b_conv[None, :, None])                     # (B, C_OUT, L)
    flat = y.reshape(y.shape[0], -1)                               # x.view(B, -1)
    h = jax.nn.relu(flat @ w_fc1.T + b_fc1)
    return h @ w_fc2.T + b_fc2


if __name__ == "__main__":
    B = 32                      # small demo batch; kernel handles any B
    L = INPUT_SAMPLES

    key = jax.random.PRNGKey(0)
    kx, kw0, kb0, kw1, kb1, kw2, kb2 = jax.random.split(key, 7)

    # PyTorch input layout: (B, L, 2); the module transposes to (B, 2, L) itself.
    x = jax.random.normal(kx, (B, L, C_IN), dtype=jnp.float32)

    # Deterministic synthetic parameters (PyTorch-layout shapes).
    w_conv = 0.1 * jax.random.normal(kw0, (C_OUT, C_IN, K), dtype=jnp.float32)
    b_conv = 0.1 * jax.random.normal(kb0, (C_OUT,), dtype=jnp.float32)
    w_fc1 = 0.05 * jax.random.normal(kw1, (HIDDEN, C_OUT * L), dtype=jnp.float32)
    b_fc1 = 0.05 * jax.random.normal(kb1, (HIDDEN,), dtype=jnp.float32)
    w_fc2 = 0.05 * jax.random.normal(kw2, (OUTPUT_FEATURES, HIDDEN), dtype=jnp.float32)
    b_fc2 = 0.05 * jax.random.normal(kb2, (OUTPUT_FEATURES,), dtype=jnp.float32)

    ref = reference_forward(x, w_conv, b_conv, w_fc1, b_fc1, w_fc2, b_fc2)

    # Full-precision path (exact-semantics check).
    out_f32 = jax.block_until_ready(
        cnn_forward(x, w_conv, b_conv, w_fc1, b_fc1, w_fc2, b_fc2,
                    compute_dtype=jnp.float32))
    assert out_f32.shape == (B, OUTPUT_FEATURES)
    assert jnp.allclose(out_f32, ref, atol=5e-4, rtol=5e-4), "f32 mismatch vs reference"

    # bf16 compute path (MXU-native on all generations); f32 accumulation.
    out_bf16 = jax.block_until_ready(
        cnn_forward(x, w_conv, b_conv, w_fc1, b_fc1, w_fc2, b_fc2,
                    compute_dtype=jnp.bfloat16))
    assert out_bf16.shape == (B, OUTPUT_FEATURES)
    assert jnp.allclose(out_bf16, ref, atol=1e-1, rtol=1e-1), "bf16 mismatch vs reference"

    print("KERNEL_OK")
</pallas_src>

<mosaic_0001>
module attributes {stable_mosaic.version = 11 : i64} {
  func.func @cnn_kernel(%arg0: i32, %arg1: memref<32x32xf32, #tpu.memory_space<vmem>>, %arg2: memref<32x256xf32, #tpu.memory_space<vmem>>, %arg3: memref<1x256xf32, #tpu.memory_space<vmem>>, %arg4: memref<256x128xf32, #tpu.memory_space<vmem>>, %arg5: memref<1x128xf32, #tpu.memory_space<vmem>>, %arg6: memref<128x128xf32, #tpu.memory_space<vmem>>, %arg7: memref<1x128xf32, #tpu.memory_space<vmem>>, %arg8: memref<32x128xf32, #tpu.memory_space<vmem>>) attributes {dimension_semantics = [#tpu.dimension_semantics<parallel>], iteration_bounds = array<i64: 1>, scalar_prefetch = 0 : i64, scratch_operands = 0 : i64, tpu.core_type = #tpu.core_type<tc>, window_params = [{transform_indices = @transform_0, window_bounds = array<i64: 32, 32>}, {pipeline_mode = #tpu.pipeline_mode<synchronous>, transform_indices = @transform_1, window_bounds = array<i64: 32, 256>}, {pipeline_mode = #tpu.pipeline_mode<synchronous>, transform_indices = @transform_2, window_bounds = array<i64: 1, 256>}, {pipeline_mode = #tpu.pipeline_mode<synchronous>, transform_indices = @transform_3, window_bounds = array<i64: 256, 128>}, {pipeline_mode = #tpu.pipeline_mode<synchronous>, transform_indices = @transform_4, window_bounds = array<i64: 1, 128>}, {pipeline_mode = #tpu.pipeline_mode<synchronous>, transform_indices = @transform_5, window_bounds = array<i64: 128, 128>}, {pipeline_mode = #tpu.pipeline_mode<synchronous>, transform_indices = @transform_6, window_bounds = array<i64: 1, 128>}, {transform_indices = @transform_7, window_bounds = array<i64: 32, 128>}]} {
    %c0 = arith.constant 0 : index
    %c0_0 = arith.constant 0 : index
    %0 = vector.load %arg1[%c0, %c0_0] : memref<32x32xf32, #tpu.memory_space<vmem>>, vector<32x32xf32>
    %c0_1 = arith.constant 0 : index
    %c0_2 = arith.constant 0 : index
    %1 = vector.load %arg2[%c0_1, %c0_2] : memref<32x256xf32, #tpu.memory_space<vmem>>, vector<32x256xf32>
    %cst = arith.constant dense<0.000000e+00> : vector<32x256xf32>
    %2 = tpu.matmul %0, %1, %cst {dimension_numbers = #tpu.dot_dimension_numbers<[1], [0], [0], [1], [0, 0, 1, 1], [], []>} : vector<32x32xf32>, vector<32x256xf32>, vector<32x256xf32> -> vector<32x256xf32>
    %c0_3 = arith.constant 0 : index
    %c0_4 = arith.constant 0 : index
    %3 = vector.load %arg3[%c0_3, %c0_4] : memref<1x256xf32, #tpu.memory_space<vmem>>, vector<1x256xf32>
    %4 = vector.broadcast %3 : vector<1x256xf32> to vector<32x256xf32>
    %5 = arith.addf %2, %4 : vector<32x256xf32>
    %cst_5 = arith.constant 0.000000e+00 : f32
    %6 = vector.broadcast %cst_5 : f32 to vector<32x256xf32>
    %7 = arith.maximumf %5, %6 : vector<32x256xf32>
    %c0_6 = arith.constant 0 : index
    %c0_7 = arith.constant 0 : index
    %8 = vector.load %arg4[%c0_6, %c0_7] : memref<256x128xf32, #tpu.memory_space<vmem>>, vector<256x128xf32>
    %cst_8 = arith.constant dense<0.000000e+00> : vector<32x128xf32>
    %9 = tpu.matmul %7, %8, %cst_8 {dimension_numbers = #tpu.dot_dimension_numbers<[1], [0], [0], [1], [0, 0, 1, 1], [], []>} : vector<32x256xf32>, vector<256x128xf32>, vector<32x128xf32> -> vector<32x128xf32>
    %c0_9 = arith.constant 0 : index
    %c0_10 = arith.constant 0 : index
    %10 = vector.load %arg5[%c0_9, %c0_10] : memref<1x128xf32, #tpu.memory_space<vmem>>, vector<1x128xf32>
    %11 = vector.broadcast %10 : vector<1x128xf32> to vector<32x128xf32>
    %12 = arith.addf %9, %11 : vector<32x128xf32>
    %cst_11 = arith.constant 0.000000e+00 : f32
    %13 = vector.broadcast %cst_11 : f32 to vector<32x128xf32>
    %14 = arith.maximumf %12, %13 : vector<32x128xf32>
    %c0_12 = arith.constant 0 : index
    %c0_13 = arith.constant 0 : index
    %15 = vector.load %arg6[%c0_12, %c0_13] : memref<128x128xf32, #tpu.memory_space<vmem>>, vector<128x128xf32>
    %cst_14 = arith.constant dense<0.000000e+00> : vector<32x128xf32>
    %16 = tpu.matmul %14, %15, %cst_14 {dimension_numbers = #tpu.dot_dimension_numbers<[1], [0], [0], [1], [0, 0, 1, 1], [], []>} : vector<32x128xf32>, vector<128x128xf32>, vector<32x128xf32> -> vector<32x128xf32>
    %c0_15 = arith.constant 0 : index
    %c0_16 = arith.constant 0 : index
    %17 = vector.load %arg7[%c0_15, %c0_16] : memref<1x128xf32, #tpu.memory_space<vmem>>, vector<1x128xf32>
    %18 = vector.broadcast %17 : vector<1x128xf32> to vector<32x128xf32>
    %19 = arith.addf %16, %18 : vector<32x128xf32>
    %c0_17 = arith.constant 0 : index
    %c0_18 = arith.constant 0 : index
    %20 = vector.load %arg8[%c0_17, %c0_18] : memref<32x128xf32, #tpu.memory_space<vmem>>, vector<32x128xf32>
    tpu.vector_store %arg8[%c0_17, %c0_18], %19 {strides = array<i32>} : memref<32x128xf32, #tpu.memory_space<vmem>>, vector<32x128xf32>,
    return
  }
  func.func @transform_0(%arg0: i32) -> (i32, i32) {
    %c0_i32 = arith.constant 0 : i32
    %c0_i32_0 = arith.constant 0 : i32
    return %arg0, %c0_i32 : i32, i32
  }
  func.func @transform_1(%arg0: i32) -> (i32, i32) {
    %c0_i32 = arith.constant 0 : i32
    %c0_i32_0 = arith.constant 0 : i32
    %c0_i32_1 = arith.constant 0 : i32
    return %c0_i32, %c0_i32_0 : i32, i32
  }
  func.func @transform_2(%arg0: i32) -> (i32, i32) {
    %c0_i32 = arith.constant 0 : i32
    %c0_i32_0 = arith.constant 0 : i32
    %c0_i32_1 = arith.constant 0 : i32
    return %c0_i32, %c0_i32_0 : i32, i32
  }
  func.func @transform_3(%arg0: i32) -> (i32, i32) {
    %c0_i32 = arith.constant 0 : i32
    %c0_i32_0 = arith.constant 0 : i32
    %c0_i32_1 = arith.constant 0 : i32
    return %c0_i32, %c0_i32_0 : i32, i32
  }
  func.func @transform_4(%arg0: i32) -> (i32, i32) {
    %c0_i32 = arith.constant 0 : i32
    %c0_i32_0 = arith.constant 0 : i32
    %c0_i32_1 = arith.constant 0 : i32
    return %c0_i32, %c0_i32_0 : i32, i32
  }
  func.func @transform_5(%arg0: i32) -> (i32, i32) {
    %c0_i32 = arith.constant 0 : i32
    %c0_i32_0 = arith.constant 0 : i32
    %c0_i32_1 = arith.constant 0 : i32
    return %c0_i32, %c0_i32_0 : i32, i32
  }
  func.func @transform_6(%arg0: i32) -> (i32, i32) {
    %c0_i32 = arith.constant 0 : i32
    %c0_i32_0 = arith.constant 0 : i32
    %c0_i32_1 = arith.constant 0 : i32
    return %c0_i32, %c0_i32_0 : i32, i32
  }
  func.func @transform_7(%arg0: i32) -> (i32, i32) {
    %c0_i32 = arith.constant 0 : i32
    %c0_i32_0 = arith.constant 0 : i32
    return %arg0, %c0_i32 : i32, i32
  }
}

</mosaic_0001>

<bundles_post_ra>
// kernel: tile.8
= control target key start
LH: loop header
LB: loop body
LE: loop exit
PB: predicated region body
PF: predicated region fallthrough
CT: control target
= control target key end

     0   :  { %s28_s0 = inlined_call_operand.vmem [shape: f32[16], index: 0, kind: input, shape index: {}]   ;;  %s29_s1 = inlined_call_operand.vmem [shape: f32[16,16], index: 1, kind: output, shape index: {}]  }
   0x1   :  { %v4_v0 = vld [vmem:[%s28_s0] ss:$0 sm:$0xff] }
   0x2   :  { %5 = vst [vmem:[%s29_s1] sm:$0xff] %v4_v0 }
   0x3   :  { %8 = vst [vmem:[%s29_s1 + $0x8] sm:$0xff] %v4_v0 }

// kernel: tile.9
= control target key start
LH: loop header
LB: loop body
LE: loop exit
PB: predicated region body
PF: predicated region fallthrough
CT: control target
= control target key end

     0   :  { %s7_s6 = smov 3  ;;  %s21_s9 = smov 3  ;;  %vm4_vm0 = vcmask 130048   ;;  %vm11_vm1 = vcmask 1048448   ;;  %vm18_vm2 = vcmask 917248   ;;  %vm25_vm3 = vcmask 786048   ;;  %s129_s0 = inlined_call_operand.vmem [shape: f32[16,16], index: 0, kind: input, shape index: {}]   ;;  %s130_s1 = inlined_call_operand.vmem [shape: f32[1,256], index: 1, kind: output, shape index: {}]  }
   0x1   :  { %v67_v0 = vld [vmem:[%s129_s0 + $0x7] ss:$8 sm:%s7_s6]   ;;  %s82_s10 = smov 112   ;;  %v69_v1 = vld [vmem:[%s129_s0 + $0x5] ss:$8 sm:%s21_s9]   ;;  %s83_s13 = smov 80  }
   0x2   :  { %9 = vrot.lane.b32.xlu0 %v67_v0, %s82_s10  ;;  %23 = vrot.lane.b32.xlu1 %v69_v1, %s83_s13  ;;  %s14_s14 = smov 3  ;;  %s28_s15 = smov 3  ;;  %vm32_vm4 = vcmask 654848   ;;  %vm39_vm5 = vcmask 523648   ;;  %vm46_vm6 = vcmask 392448   ;;  %vm53_vm7 = vcmask 261248  }
   0x3   :  { %s35_s16 = smov 3  ;;  %v68_v3 = vld [vmem:[%s129_s0 + $0x6] ss:$8 sm:%s14_s14]   ;;  %s84_s21 = smov 48   ;;  %v70_v4 = vld [vmem:[%s129_s0 + $0x4] ss:$8 sm:%s28_s15]  }
   0x4   :  { %v71_v2 = vld [vmem:[%s129_s0 + $0x3] ss:$8 sm:%s35_s16]   ;;  %s42_s24 = smov 3  ;;  %s85_s25 = smov 96  }
   0x5   :  { %37 = vrot.lane.b32.xlu2 %v71_v2, %s84_s21  ;;  %s86_s26 = smov 64   ;;  %s49_s27 = smov 3  ;;  %v72_v5 = vld [vmem:[%s129_s0 + $0x2] ss:$8 sm:%s42_s24]  }
   0x6   :  { %v73_v6 = vld [vmem:[%s129_s0 + $0x1] ss:$8 sm:%s49_s27]   ;;  %s87_s3 = smov 32   ;;  %s88_s4 = smov 16  }
   0x7   :  { %s2_s5 = smov 3 }
   0x8   :  { %v3_v7 = vld [vmem:[%s129_s0] ss:$8 sm:%s2_s5]  }
   0x9   :  { %5 = vst.msk [vmem:[#allocation0] ss:$8 sm:$0x3] %vm4_vm0, %v3_v7  }
   0xa   :  { %16 = vrot.lane.b32.xlu0 %v68_v3, %s85_s25  ;;  %30 = vrot.lane.b32.xlu1 %v70_v4, %s86_s26 }
   0xd   :  { %44 = vrot.lane.b32.xlu2 %v72_v5, %s87_s3 }
  0x12   :  { %51 = vrot.lane.b32.xlu0 %v73_v6, %s88_s4 }
  0x5f   :  { %v38_v8 = vpop.permute.xlu2 %37  }
  0x67   :  { %v45_v9 = vpop.permute.xlu2 %44  }
  0x74   :  { %v10_v10 = vpop.permute.xlu0 %9   ;;  %v24_v11 = vpop.permute.xlu1 %23  }
  0x75   :  { %12 = vst.msk [vmem:[#allocation0] ss:$8 sm:$0x3] %vm11_vm1, %v10_v10  }
  0x7c   :  { %v17_v12 = vpop.permute.xlu0 %16   ;;  %v31_v13 = vpop.permute.xlu1 %30  }
  0x7d   :  { %19 = vst.msk [vmem:[#allocation0] ss:$8 sm:$0x3] %vm18_vm2, %v17_v12  }
  0x7e   :  { %26 = vst.msk [vmem:[#allocation0] ss:$8 sm:$0x3] %vm25_vm3, %v24_v11  }
  0x7f   :  { %33 = vst.msk [vmem:[#allocation0] ss:$8 sm:$0x3] %vm32_vm4, %v31_v13  }
  0x80   :  { %40 = vst.msk [vmem:[#allocation0] ss:$8 sm:$0x3] %vm39_vm5, %v38_v8  }
  0x81   :  { %47 = vst.msk [vmem:[#allocation0] ss:$8 sm:$0x3] %vm46_vm6, %v45_v9  }
  0x84   :  { %v52_v14 = vpop.permute.xlu0 %51  }
  0x85   :  { %54 = vst.msk [vmem:[#allocation0] ss:$8 sm:$0x3] %vm53_vm7, %v52_v14  }
  0x8c   :  { %v57_v15 = vld [vmem:[#allocation0] sm:$0x1]  ;;  %v62_v16 = vld [vmem:[#allocation0 + $0x8] sm:$0x1] }
  0x8d   :  { %60 = vst [vmem:[%s130_s1] sm:$0x1] %v57_v15 }
  0x8e   :  { %74 = vst [vmem:[%s130_s1 + $0x1] sm:$0x1] %v62_v16 }

// kernel: cnn_forward.1
= control target key start
LH: loop header
LB: loop body
LE: loop exit
PB: predicated region body
PF: predicated region fallthrough
CT: control target
= control target key end

     0   :  { %vm44_vm0 = vcmask 261120   ;;  %s565_s1 = inlined_call_operand.vmem [shape: f32[32,256], index: 1, kind: input, shape index: {}]   ;;  %s566_s3 = inlined_call_operand.vmem [shape: f32[256,128], index: 3, kind: input, shape index: {}]   ;;  %s567_s0 = inlined_call_operand.vmem [shape: f32[32,32], index: 0, kind: input, shape index: {}]   ;;  %s568_s4 = inlined_call_operand.vmem [shape: f32[1,128], index: 4, kind: input, shape index: {}]   ;;  %s569_s2 = inlined_call_operand.vmem [shape: f32[1,256], index: 2, kind: input, shape index: {}]   ;;  %s570_s5 = inlined_call_operand.vmem [shape: f32[128,128], index: 5, kind: input, shape index: {}]   ;;  %s571_s6 = inlined_call_operand.vmem [shape: f32[1,128], index: 6, kind: input, shape index: {}]   ;;  %s572_s7 = inlined_call_operand.vmem [shape: f32[32,128], index: 7, kind: output, shape index: {}]  }
   0x1   :  { %v36_v0 = vld [vmem:[%s565_s1 + $0x30] sm:$0xff]  ;;  %v34_v1 = vld [vmem:[%s565_s1 + $0x20] sm:$0xff]  ;;  %v37_v2 = vld [vmem:[%s565_s1 + $0x38] sm:$0xff] }
   0x2   :  { %69 = vmatpush.msra.mxu0 %v36_v0  ;;  %98 = vmatpush.msra.mxu1 %v37_v2  ;;  %v35_v3 = vld [vmem:[%s565_s1 + $0x28] sm:$0xff]  ;;  %v32_v4 = vld [vmem:[%s565_s1 + $0x10] sm:$0xff]  ;;  %v33_v5 = vld [vmem:[%s565_s1 + $0x18] sm:$0xff] }
   0x3   :  { %v30_v6 = vld [vmem:[%s565_s1] sm:$0xff]  ;;  %v31_v7 = vld [vmem:[%s565_s1 + $0x8] sm:$0xff]  ;;  %v138_v8 = vld [vmem:[%s566_s3 + $0x78] sm:$0xff] }
   0x4   :  { %70 = vmatpush.msra.mxu0 %v34_v1  ;;  %99 = vmatpush.msra.mxu1 %v35_v3  ;;  %v154_v9 = vld [vmem:[%s566_s3 + $0xf8] sm:$0xff]  ;;  %v26_v10 = vld [vmem:[%s567_s0] sm:$0xff]  ;;  %v137_v11 = vld [vmem:[%s566_s3 + $0x70] sm:$0xff] }
   0x5   :  { %159 = vmatpush.msra.mxu2 %v138_v8  ;;  %188 = vmatpush.msra.mxu3 %v154_v9  ;;  %v153_v12 = vld [vmem:[%s566_s3 + $0xf0] sm:$0xff]  ;;  %v136_v13 = vld [vmem:[%s566_s3 + $0x68] sm:$0xff]  ;;  %v135_v15 = vld [vmem:[%s566_s3 + $0x60] sm:$0xff] }
   0x6   :  { %71 = vmatpush.msra.mxu0 %v32_v4  ;;  %100 = vmatpush.msra.mxu1 %v33_v5  ;;  %v152_v14 = vld [vmem:[%s566_s3 + $0xe8] sm:$0xff]  ;;  %v151_v16 = vld [vmem:[%s566_s3 + $0xe0] sm:$0xff]  ;;  %v134_v17 = vld [vmem:[%s566_s3 + $0x58] sm:$0xff] }
   0x7   :  { %160 = vmatpush.msra.mxu2 %v137_v11  ;;  %189 = vmatpush.msra.mxu3 %v153_v12  ;;  %v150_v18 = vld [vmem:[%s566_s3 + $0xd8] sm:$0xff]  ;;  %v27_v19 = vld [vmem:[%s567_s0 + $0x8] sm:$0xff]  ;;  %v133_v20 = vld [vmem:[%s566_s3 + $0x50] sm:$0xff] }
   0x8   :  { %72 = vmatpush.msra.mxu0 %v30_v6  ;;  %101 = vmatpush.msra.mxu1 %v31_v7  ;;  %v149_v21 = vld [vmem:[%s566_s3 + $0xd0] sm:$0xff]  ;;  %v132_v22 = vld [vmem:[%s566_s3 + $0x48] sm:$0xff]  ;;  %v131_v24 = vld [vmem:[%s566_s3 + $0x40] sm:$0xff] }
   0x9   :  { %278 = vmatmul.msk.f32.vlgmr.msra.gmra.mxu0 %vm44_vm0, %v26_v10  ;;  %282 = vmatmul.msk.f32.vlgmr.msra.gmra.mxu1 %vm44_vm0, %v26_v10  ;;  %v148_v23 = vld [vmem:[%s566_s3 + $0xc8] sm:$0xff]  ;;  %v147_v25 = vld [vmem:[%s566_s3 + $0xc0] sm:$0xff]  ;;  %v130_v26 = vld [vmem:[%s566_s3 + $0x38] sm:$0xff] }
   0xa   :  { %161 = vmatpush.msra.mxu2 %v136_v13  ;;  %190 = vmatpush.msra.mxu3 %v152_v14  ;;  %v146_v27 = vld [vmem:[%s566_s3 + $0xb8] sm:$0xff]  ;;  %v28_v28 = vld [vmem:[%s567_s0 + $0x10] sm:$0xff]  ;;  %v128_v31 = vld [vmem:[%s566_s3 + $0x28] sm:$0xff] }
   0xb   :  { %v129_v29 = vld [vmem:[%s566_s3 + $0x30] sm:$0xff]  ;;  %v144_v32 = vld [vmem:[%s566_s3 + $0xa8] sm:$0xff]  ;;  %v127_v33 = vld [vmem:[%s566_s3 + $0x20] sm:$0xff] }
   0xc   :  { %162 = vmatpush.msra.mxu2 %v135_v15  ;;  %191 = vmatpush.msra.mxu3 %v151_v16  ;;  %v145_v30 = vld [vmem:[%s566_s3 + $0xb0] sm:$0xff]  ;;  %v143_v34 = vld [vmem:[%s566_s3 + $0xa0] sm:$0xff]  ;;  %v126_v35 = vld [vmem:[%s566_s3 + $0x18] sm:$0xff] }
   0xd   :  { %v29_v36 = vld [vmem:[%s567_s0 + $0x18] sm:$0xff]  ;;  %v125_v37 = vld [vmem:[%s566_s3 + $0x10] sm:$0xff]  ;;  %v124_v39 = vld [vmem:[%s566_s3 + $0x8] sm:$0xff] }
   0xe   :  { %163 = vmatpush.msra.mxu2 %v134_v17  ;;  %192 = vmatpush.msra.mxu3 %v150_v18  ;;  %v142_v38 = vld [vmem:[%s566_s3 + $0x98] sm:$0xff]  ;;  %v141_v40 = vld [vmem:[%s566_s3 + $0x90] sm:$0xff]  ;;  %v123_v41 = vld [vmem:[%s566_s3] sm:$0xff] }
   0xf   :  { %v140_v42 = vld [vmem:[%s566_s3 + $0x88] sm:$0xff]  ;;  %v139_v43 = vld [vmem:[%s566_s3 + $0x80] sm:$0xff]  ;;  %v236_v47 = vld [vmem:[%s570_s5 + $0x78] sm:$0xff] }
  0x10   :  { %164 = vmatpush.msra.mxu2 %v133_v20  ;;  %193 = vmatpush.msra.mxu3 %v149_v21  ;;  %v38_v44 = vld [vmem:[%s569_s2] sm:$0x3]  ;;  %v235_v48 = vld [vmem:[%s570_s5 + $0x70] sm:$0xff]  ;;  %v234_v49 = vld [vmem:[%s570_s5 + $0x68] sm:$0xff] }
  0x11   :  { %279 = vmatmul.msk.f32.gmra.mxu0 %vm44_vm0, %v27_v19  ;;  %283 = vmatmul.msk.f32.gmra.mxu1 %vm44_vm0, %v27_v19  ;;  %v487_v45 = vperm.slane %v38_v44, 0  ;;  %v489_v46 = vperm.slane %v38_v44, 1  ;;  %v233_v54 = vld [vmem:[%s570_s5 + $0x60] sm:$0xff]  ;;  %v232_v57 = vld [vmem:[%s570_s5 + $0x58] sm:$0xff]  ;;  %v231_v58 = vld [vmem:[%s570_s5 + $0x50] sm:$0xff] }
  0x12   :  { %165 = vmatpush.msra.mxu2 %v132_v22  ;;  %194 = vmatpush.msra.mxu3 %v148_v23  ;;  %v230_v59 = vld [vmem:[%s570_s5 + $0x48] sm:$0xff]  ;;  %v229_v0 = vld [vmem:[%s570_s5 + $0x40] sm:$0xff]  ;;  %v228_v3 = vld [vmem:[%s570_s5 + $0x38] sm:$0xff] }
  0x13   :  { %241 = vmatpush.msrb.mxu0 %v236_v47  ;;  %286 = vmatpush.msrb.mxu1 %v236_v47  ;;  %v227_v4 = vld [vmem:[%s570_s5 + $0x30] sm:$0xff]  ;;  %v226_v5 = vld [vmem:[%s570_s5 + $0x28] sm:$0xff]  ;;  %v225_v10 = vld [vmem:[%s570_s5 + $0x20] sm:$0xff] }
  0x14   :  { %166 = vmatpush.msra.mxu2 %v131_v24  ;;  %195 = vmatpush.msra.mxu3 %v147_v25  ;;  %v224_v19 = vld [vmem:[%s570_s5 + $0x18] sm:$0xff]  ;;  %v223_v20 = vld [vmem:[%s570_s5 + $0x10] sm:$0xff]  ;;  %v222_v21 = vld [vmem:[%s570_s5 + $0x8] sm:$0xff] }
  0x15   :  { %242 = vmatpush.msrb.mxu0 %v235_v48  ;;  %287 = vmatpush.msrb.mxu1 %v235_v48  ;;  %v221_v22 = vld [vmem:[%s570_s5] sm:$0xff] }
  0x16   :  { %167 = vmatpush.msra.mxu2 %v130_v26  ;;  %196 = vmatpush.msra.mxu3 %v146_v27  ;;  %v302_v23 = vld [vmem:[%s568_s4] ss:$0 sm:$0xff] }
  0x17   :  { %243 = vmatpush.msrb.mxu0 %v234_v49  ;;  %288 = vmatpush.msrb.mxu1 %v234_v49  ;;  %v303_v44 = vld [vmem:[%s571_s6] ss:$0 sm:$0xff] }
  0x18   :  { %168 = vmatpush.msra.mxu2 %v129_v29  ;;  %197 = vmatpush.msra.mxu3 %v145_v30 }
  0x19   :  { %280 = vmatmul.msk.f32.gmra.mxu0 %vm44_vm0, %v28_v28  ;;  %284 = vmatmul.msk.f32.gmra.mxu1 %vm44_vm0, %v28_v28 }
  0x1a   :  { %169 = vmatpush.msra.mxu2 %v128_v31  ;;  %198 = vmatpush.msra.mxu3 %v144_v32 }
  0x1b   :  { %244 = vmatpush.msrb.mxu0 %v233_v54  ;;  %289 = vmatpush.msrb.mxu1 %v233_v54 }
  0x1c   :  { %170 = vmatpush.msra.mxu2 %v127_v33  ;;  %199 = vmatpush.msra.mxu3 %v143_v34 }
  0x1d   :  { %245 = vmatpush.msrb.mxu0 %v232_v57  ;;  %290 = vmatpush.msrb.mxu1 %v232_v57 }
  0x1e   :  { %171 = vmatpush.msra.mxu2 %v126_v35  ;;  %200 = vmatpush.msra.mxu3 %v142_v38 }
  0x1f   :  { %246 = vmatpush.msrb.mxu0 %v231_v58  ;;  %291 = vmatpush.msrb.mxu1 %v231_v58 }
  0x20   :  { %172 = vmatpush.msra.mxu2 %v125_v37  ;;  %201 = vmatpush.msra.mxu3 %v141_v40 }
  0x21   :  { %281 = vmatmul.msk.f32.gmra.mxu0 %vm44_vm0, %v29_v36  ;;  %285 = vmatmul.msk.f32.gmra.mxu1 %vm44_vm0, %v29_v36 }
  0x22   :  { %173 = vmatpush.msra.mxu2 %v124_v39  ;;  %202 = vmatpush.msra.mxu3 %v140_v42 }
  0x23   :  { %247 = vmatpush.msrb.mxu0 %v230_v59  ;;  %292 = vmatpush.msrb.mxu1 %v230_v59 }
  0x24   :  { %174 = vmatpush.msra.mxu2 %v123_v41  ;;  %203 = vmatpush.msra.mxu3 %v139_v43 }
  0x25   :  { %248 = vmatpush.msrb.mxu0 %v229_v0  ;;  %293 = vmatpush.msrb.mxu1 %v229_v0 }
  0x27   :  { %249 = vmatpush.msrb.mxu0 %v228_v3  ;;  %294 = vmatpush.msrb.mxu1 %v228_v3 }
  0x29   :  { %250 = vmatpush.msrb.mxu0 %v227_v4  ;;  %295 = vmatpush.msrb.mxu1 %v227_v4 }
  0x2b   :  { %251 = vmatpush.msrb.mxu0 %v226_v5  ;;  %296 = vmatpush.msrb.mxu1 %v226_v5 }
  0x2d   :  { %252 = vmatpush.msrb.mxu0 %v225_v10  ;;  %297 = vmatpush.msrb.mxu1 %v225_v10 }
  0x2f   :  { %253 = vmatpush.msrb.mxu0 %v224_v19  ;;  %298 = vmatpush.msrb.mxu1 %v224_v19 }
  0x31   :  { %254 = vmatpush.msrb.mxu0 %v223_v20  ;;  %299 = vmatpush.msrb.mxu1 %v223_v20 }
  0x33   :  { %255 = vmatpush.msrb.mxu0 %v222_v21  ;;  %300 = vmatpush.msrb.mxu1 %v222_v21 }
  0x35   :  { %256 = vmatpush.msrb.mxu0 %v221_v22  ;;  %301 = vmatpush.msrb.mxu1 %v221_v22 }
  0x86   :  { %v74_v50 = vpop.f32.mrf.mxu0  ;;  %v103_v51 = vpop.f32.mrf.mxu1 }
  0x87   :  { %v75_v52 = vadd.f32 %v74_v50, %v487_v45  ;;  %v104_v53 = vadd.f32 %v103_v51, %v489_v46 }
  0x89   :  { %v115_v55 = vmax.f32 %v75_v52, 0.0  ;;  %v116_v56 = vmax.f32 %v104_v53, 0.0 }
  0x8b   :  { %175 = vmatmul.f32.vlgmr.msra.gmra.mxu2 %v115_v55  ;;  %204 = vmatmul.f32.vlgmr.msra.gmra.mxu3 %v116_v56 }
  0x8e   :  { %v77_v60 = vpop.f32.mrf.mxu0  ;;  %v106_v61 = vpop.f32.mrf.mxu1 }
  0x8f   :  { %v78_v62 = vadd.f32 %v77_v60, %v487_v45  ;;  %v107_v63 = vadd.f32 %v106_v61, %v489_v46 }
  0x91   :  { %v117_v1 = vmax.f32 %v78_v62, 0.0  ;;  %v118_v2 = vmax.f32 %v107_v63, 0.0 }
  0x93   :  { %178 = vmatmul.f32.gmra.mxu2 %v117_v1  ;;  %207 = vmatmul.f32.gmra.mxu3 %v118_v2 }
  0x96   :  { %v80_v6 = vpop.f32.mrf.mxu0  ;;  %v109_v7 = vpop.f32.mrf.mxu1 }
  0x97   :  { %v81_v8 = vadd.f32 %v80_v6, %v487_v45  ;;  %v110_v9 = vadd.f32 %v109_v7, %v489_v46 }
  0x99   :  { %v119_v11 = vmax.f32 %v81_v8, 0.0  ;;  %v120_v12 = vmax.f32 %v110_v9, 0.0 }
  0x9b   :  { %181 = vmatmul.f32.gmra.mxu2 %v119_v11  ;;  %210 = vmatmul.f32.gmra.mxu3 %v120_v12 }
  0x9e   :  { %v83_v13 = vpop.f32.mrf.mxu0  ;;  %v112_v14 = vpop.f32.mrf.mxu1 }
  0x9f   :  { %v84_v15 = vadd.f32 %v83_v13, %v487_v45  ;;  %v113_v16 = vadd.f32 %v112_v14, %v489_v46 }
  0xa1   :  { %v121_v17 = vmax.f32 %v84_v15, 0.0  ;;  %v122_v18 = vmax.f32 %v113_v16, 0.0 }
  0xa3   :  { %184 = vmatmul.f32.gmra.mxu2 %v121_v17  ;;  %213 = vmatmul.f32.gmra.mxu3 %v122_v18 }
 0x10e   :  { %v176_v24 = vpop.f32.mrf.mxu2  ;;  %v205_v25 = vpop.f32.mrf.mxu3 }
 0x10f   :  { %v177_v26 = vadd.f32 %v302_v23, %v176_v24 }
 0x111   :  { %v206_v27 = vadd.f32 %v205_v25, %v177_v26 }
 0x113   :  { %v217_v28 = vmax.f32 %v206_v27, 0.0 }
 0x115   :  { %257 = vmatmul.f32.vlgmr.msrb.gmra.mxu0 %v217_v28 }
 0x116   :  { %v179_v29 = vpop.f32.mrf.mxu2  ;;  %v208_v30 = vpop.f32.mrf.mxu3 }
 0x117   :  { %v180_v31 = vadd.f32 %v302_v23, %v179_v29 }
 0x119   :  { %v209_v32 = vadd.f32 %v208_v30, %v180_v31 }
 0x11b   :  { %v218_v33 = vmax.f32 %v209_v32, 0.0 }
 0x11d   :  { %260 = vmatmul.f32.vlgmr.msrb.gmra.mxu1 %v218_v33 }
 0x11e   :  { %v182_v34 = vpop.f32.mrf.mxu2  ;;  %v211_v35 = vpop.f32.mrf.mxu3 }
 0x11f   :  { %v183_v36 = vadd.f32 %v302_v23, %v182_v34 }
 0x121   :  { %v212_v37 = vadd.f32 %v211_v35, %v183_v36 }
 0x123   :  { %v219_v38 = vmax.f32 %v212_v37, 0.0 }
 0x125   :  { %263 = vmatmul.f32.gmra.mxu1 %v219_v38 }
 0x126   :  { %v185_v39 = vpop.f32.mrf.mxu2  ;;  %v214_v40 = vpop.f32.mrf.mxu3 }
 0x127   :  { %v186_v41 = vadd.f32 %v302_v23, %v185_v39 }
 0x129   :  { %v215_v42 = vadd.f32 %v214_v40, %v186_v41 }
 0x12b   :  { %v220_v43 = vmax.f32 %v215_v42, 0.0 }
 0x12d   :  { %266 = vmatmul.f32.gmra.mxu1 %v220_v43 }
 0x192   :  { %v258_v45 = vpop.f32.mrf.mxu0 }
 0x193   :  { %v259_v46 = vadd.f32 %v303_v44, %v258_v45 }
 0x195   :  { %270 = vst [vmem:[%s572_s7] sm:$0xff] %v259_v46 }
 0x19a   :  { %v261_v47 = vpop.f32.mrf.mxu1 }
 0x19b   :  { %v262_v48 = vadd.f32 %v303_v44, %v261_v47 }
 0x19d   :  { %271 = vst [vmem:[%s572_s7 + $0x8] sm:$0xff] %v262_v48 }
 0x1a2   :  { %v264_v49 = vpop.f32.mrf.mxu1 }
 0x1a3   :  { %v265_v50 = vadd.f32 %v303_v44, %v264_v49 }
 0x1a5   :  { %272 = vst [vmem:[%s572_s7 + $0x10] sm:$0xff] %v265_v50 }
 0x1aa   :  { %v267_v51 = vpop.f32.mrf.mxu1 }
 0x1ab   :  { %v268_v52 = vadd.f32 %v303_v44, %v267_v51 }
 0x1ad   :  { %273 = vst [vmem:[%s572_s7 + $0x18] sm:$0xff] %v268_v52 }

</bundles_post_ra>
